<compile_context>
chip_gen: v7x
topology: tpu7x:2x2x1
jax: 0.10.0
libtpu: 0.0.40
codegen_flags: <defaults>
</compile_context>

<pallas_src>
import functools

import jax
import jax.numpy as jnp
from jax.experimental import pallas as pl
from jax.experimental.pallas import tpu as pltpu


# Tap enumeration order shared by the fused weight, the host masks, and the kernel.
_TAPS = tuple((sh, sw) for sh in (-1, 0, 1) for sw in (-1, 0, 1))


def _motif22_kernel(x_ref, mask_ref, wf_ref, bias_ref, o_ref, taps_ref, *, C, W, L):
    """Fused motif_2_2 forward on one lane-dense (C, L = N*H*W) slab.

    x_ref    : (C, L)    f32   input, batch+spatial flattened onto lanes
    mask_ref : (9, L)    f32   per-tap zero-padding border masks (host precomputed)
    wf_ref   : (C, 9*C)  bf16  fused weight (BN-folded pointwise x depthwise taps)
    bias_ref : (C, 1)    f32   folded BN shift
    o_ref    : (C, L)    f32   output
    taps_ref : (9*C, L)  bf16  VMEM scratch: stacked rolled+masked taps (matmul RHS)
    """
    x = x_ref[...].astype(jnp.float32)                        # (C, L)

    # Build the (9C, L) matmul operand: each tap is a lane-roll of the flat slab
    # (XLU slot, no slice copies) times its precomputed border mask.  The masks
    # implement the 3x3 zero halo and also kill wrap-around leakage across image
    # boundaries of the flattened batch axis.
    for t, (sh, sw) in enumerate(_TAPS):
        d = sh * W + sw                                       # flat offset of this tap
        shifted = x if d == 0 else pltpu.roll(x, (-d) % L, axis=1)
        if sh == 0 and sw == 0:
            tap_val = shifted                                 # center tap: no mask
        else:
            tap_val = shifted * mask_ref[pl.ds(t, 1), :]      # (1, L) sublane-bcast
        taps_ref[pl.ds(t * C, C), :] = tap_val.astype(taps_ref.dtype)

    # Depthwise 3x3 + pointwise 1x1 + BN scale as ONE MXU matmul (K = 9*C),
    # bf16 operands with f32 accumulation.
    pw = jnp.dot(wf_ref[...], taps_ref[...],
                 preferred_element_type=jnp.float32)          # (C, L)

    # Folded BN shift + ReLU, then the motif_2_2 residual adds (identity branch + skip).
    y = jnp.maximum(pw + bias_ref[...], 0.0)
    o_ref[...] = (y + 2.0 * x).astype(o_ref.dtype)


def _fold_bn(w_pw, gamma, beta, running_mean, running_var, eps):
    """Fold inference-mode BatchNorm into the pointwise conv: bn(W @ d) = (s*W) @ d + t."""
    scale = gamma / jnp.sqrt(running_var + eps)               # (C,)
    w_fold = w_pw.reshape(w_pw.shape[0], w_pw.shape[1]) * scale[:, None]  # (C_out, C_in)
    shift = beta - running_mean * scale                       # (C,)
    return w_fold.astype(jnp.float32), shift.astype(jnp.float32)


def _build_fused_weight(w_dw, w_pw, gamma, beta, running_mean, running_var, eps):
    """W_fused[o, t*C + c] = scale[o] * w_pw[o, c] * w_dw[c, tap(t)]  -> (C, 9C) bf16."""
    C = w_pw.shape[0]
    w_fold, shift = _fold_bn(w_pw, gamma, beta, running_mean, running_var, eps)
    k9 = w_dw.reshape(C, 9).astype(jnp.float32)               # k9[c, kh*3 + kw]
    blocks = []
    for sh, sw in _TAPS:
        tap = (sh + 1) * 3 + (sw + 1)
        blocks.append(w_fold * k9[:, tap][None, :])           # column-scale by tap weight
    w_fused = jnp.concatenate(blocks, axis=1).astype(jnp.bfloat16)   # (C, 9C)
    bias = shift.reshape(C, 1)
    return w_fused, bias


def _build_tap_masks(N, H, W):
    """(9, N*H*W) f32 masks implementing the 3x3 zero halo (and image-boundary guard)."""
    HW = H * W
    L = N * HW
    p = jnp.arange(L, dtype=jnp.int32)
    local = p % HW
    row = local // W
    col = local % W
    rows = []
    ones = jnp.ones((L,), jnp.bool_)
    for sh, sw in _TAPS:
        m = ones
        if sh == 1:
            m = m & (row < H - 1)
        elif sh == -1:
            m = m & (row >= 1)
        if sw == 1:
            m = m & (col < W - 1)
        elif sw == -1:
            m = m & (col >= 1)
        rows.append(m)
    return jnp.stack(rows, axis=0).astype(jnp.float32)        # (9, L)


def motif_2_2_forward(x, w_dw, w_pw, gamma, beta, running_mean, running_var, eps=1e-5):
    """motif_2_2 forward: ReLU(BN(pointwise(depthwise3x3(x)))) + 2*x.

    x    : (N, C, H, W) f32
    w_dw : (C, 1, 3, 3) depthwise conv weight (PyTorch layout, groups=C, no bias)
    w_pw : (C, C, 1, 1) pointwise conv weight (no bias)
    gamma/beta/running_mean/running_var : (C,) BatchNorm parameters.
    """
    N, C, H, W = x.shape
    HW = H * W
    L = N * HW
    assert L % 128 == 0 and C % 8 == 0, "kernel assumes lane/sublane-aligned slab"

    # Layout plumbing (outside the kernel): one lane-dense (C, N*H*W) slab so the whole
    # problem is a single grid step with 512-lane unmasked loads/stores.
    x_slab = jnp.transpose(x, (1, 0, 2, 3)).reshape(C, L).astype(jnp.float32)
    masks = _build_tap_masks(N, H, W)
    # TODO(synk): BatchNorm is folded in inference mode (running stats); training-mode
    # batch statistics are not computed in-kernel.
    w_fused, bias = _build_fused_weight(w_dw, w_pw, gamma, beta,
                                        running_mean, running_var, eps)

    kernel = functools.partial(_motif22_kernel, C=C, W=W, L=L)
    out_slab = pl.pallas_call(
        kernel,
        out_shape=jax.ShapeDtypeStruct((C, L), x.dtype),
        grid_spec=pltpu.PrefetchScalarGridSpec(
            num_scalar_prefetch=0,
            grid=(1,),                       # single step: whole problem in one shot
            in_specs=[
                pl.BlockSpec((C, L), lambda i: (0, 0)),
                pl.BlockSpec((9, L), lambda i: (0, 0)),
                pl.BlockSpec((C, 9 * C), lambda i: (0, 0)),
                pl.BlockSpec((C, 1), lambda i: (0, 0)),
            ],
            out_specs=pl.BlockSpec((C, L), lambda i: (0, 0)),
            scratch_shapes=[pltpu.VMEM((9 * C, L), jnp.bfloat16)],
        ),
        compiler_params=pltpu.CompilerParams(
            dimension_semantics=("arbitrary",),
            # Explicit VMEM budget (~0.6 MiB used at this size).  At production C/H/W,
            # tile the L axis into >=512-lane chunks and re-budget against v7x's 64 MiB.
            vmem_limit_bytes=16 * 1024 * 1024,
        ),
    )(x_slab, masks, w_fused, bias)

    return jnp.transpose(out_slab.reshape(C, N, H, W), (1, 0, 2, 3))


def _reference(x, w_dw, w_pw, gamma, beta, running_mean, running_var, eps=1e-5):
    """Pure-JAX reference of motif_2_2's forward (inference-mode BN)."""
    N, C, H, W = x.shape
    xp = jnp.pad(x.astype(jnp.float32), ((0, 0), (0, 0), (1, 1), (1, 1)))
    k = w_dw.reshape(C, 9).astype(jnp.float32)
    dw = jnp.zeros(x.shape, jnp.float32)
    for sh in (-1, 0, 1):
        for sw in (-1, 0, 1):
            tap = (sh + 1) * 3 + (sw + 1)
            kt = k[:, tap].reshape(1, C, 1, 1)
            dw = dw + xp[:, :, 1 + sh:1 + sh + H, 1 + sw:1 + sw + W] * kt
    w_fold, shift = _fold_bn(w_pw, gamma, beta, running_mean, running_var, eps)
    pw = jnp.einsum("oc,nchw->nohw", w_fold, dw, precision=jax.lax.Precision.HIGHEST)
    y = jnp.maximum(pw + shift.reshape(1, C, 1, 1), 0.0)
    return (y + 2.0 * x).astype(x.dtype)


if __name__ == "__main__":
    key = jax.random.PRNGKey(0)
    kx, kdw, kpw, kg, kb, km, kv = jax.random.split(key, 7)

    # Small shapes consistent with the module (c0 = 16 channels).
    N, C, H, W = 2, 16, 16, 16
    x = jax.random.normal(kx, (N, C, H, W), dtype=jnp.float32)
    w_dw = jax.random.normal(kdw, (C, 1, 3, 3), dtype=jnp.float32) / 3.0
    w_pw = jax.random.normal(kpw, (C, C, 1, 1), dtype=jnp.float32) / 4.0
    gamma = 1.0 + 0.1 * jax.random.normal(kg, (C,), dtype=jnp.float32)
    beta = 0.1 * jax.random.normal(kb, (C,), dtype=jnp.float32)
    running_mean = 0.1 * jax.random.normal(km, (C,), dtype=jnp.float32)
    running_var = 1.0 + 0.5 * jax.random.uniform(kv, (C,), dtype=jnp.float32)

    out = motif_2_2_forward(x, w_dw, w_pw, gamma, beta, running_mean, running_var)
    out = jax.block_until_ready(out)

    ref = _reference(x, w_dw, w_pw, gamma, beta, running_mean, running_var)
    assert out.shape == (N, C, H, W)
    # Tolerance covers the bf16 MXU operands (f32 accumulation) vs. the
    # HIGHEST-precision reference einsum; measured error is ~1e-2 worst-case here.
    assert jnp.allclose(out, ref, atol=3e-2, rtol=3e-2), float(jnp.max(jnp.abs(out - ref)))

    print("KERNEL_OK")
</pallas_src>

<mosaic_0001>
module attributes {stable_mosaic.version = 11 : i64} {
  func.func @_motif22_kernel(%arg0: i32, %arg1: memref<16x512xf32, #tpu.memory_space<vmem>>, %arg2: memref<9x512xf32, #tpu.memory_space<vmem>>, %arg3: memref<16x144xbf16, #tpu.memory_space<vmem>>, %arg4: memref<16x1xf32, #tpu.memory_space<vmem>>, %arg5: memref<16x512xf32, #tpu.memory_space<vmem>>, %arg6: memref<144x512xbf16, #tpu.memory_space<vmem>>) attributes {dimension_semantics = [#tpu.dimension_semantics<arbitrary>], iteration_bounds = array<i64: 1>, scalar_prefetch = 0 : i64, scratch_operands = 1 : i64, tpu.core_type = #tpu.core_type<tc>, window_params = [{pipeline_mode = #tpu.pipeline_mode<synchronous>, transform_indices = @transform_0, window_bounds = array<i64: 16, 512>}, {pipeline_mode = #tpu.pipeline_mode<synchronous>, transform_indices = @transform_1, window_bounds = array<i64: 9, 512>}, {pipeline_mode = #tpu.pipeline_mode<synchronous>, transform_indices = @transform_2, window_bounds = array<i64: 16, 144>}, {pipeline_mode = #tpu.pipeline_mode<synchronous>, transform_indices = @transform_3, window_bounds = array<i64: 16, 1>}, {pipeline_mode = #tpu.pipeline_mode<synchronous>, transform_indices = @transform_4, window_bounds = array<i64: 16, 512>}]} {
    %c0 = arith.constant 0 : index
    %c0_0 = arith.constant 0 : index
    %0 = vector.load %arg1[%c0, %c0_0] : memref<16x512xf32, #tpu.memory_space<vmem>>, vector<16x512xf32>
    %c17_i32 = arith.constant 17 : i32
    %1 = tpu.dynamic_rotate %0 by %c17_i32 dim 1 : vector<16x512xf32>, i32 -> vector<16x512xf32>
    %c0_1 = arith.constant 0 : index
    %c0_2 = arith.constant 0 : index
    %2 = vector.load %arg2[%c0_1, %c0_2] : memref<9x512xf32, #tpu.memory_space<vmem>>, vector<1x512xf32>
    %3 = vector.broadcast %2 : vector<1x512xf32> to vector<16x512xf32>
    %4 = arith.mulf %1, %3 : vector<16x512xf32>
    %5 = arith.truncf %4 : vector<16x512xf32> to vector<16x512xbf16>
    %c0_3 = arith.constant 0 : index
    %c0_4 = arith.constant 0 : index
    %6 = vector.load %arg6[%c0_3, %c0_4] : memref<144x512xbf16, #tpu.memory_space<vmem>>, vector<16x512xbf16>
    tpu.vector_store %arg6[%c0_3, %c0_4], %5 {strides = array<i32>} : memref<144x512xbf16, #tpu.memory_space<vmem>>, vector<16x512xbf16>,
    %c16_i32 = arith.constant 16 : i32
    %7 = tpu.dynamic_rotate %0 by %c16_i32 dim 1 : vector<16x512xf32>, i32 -> vector<16x512xf32>
    %c1 = arith.constant 1 : index
    %c0_5 = arith.constant 0 : index
    %8 = vector.load %arg2[%c1, %c0_5] : memref<9x512xf32, #tpu.memory_space<vmem>>, vector<1x512xf32>
    %9 = vector.broadcast %8 : vector<1x512xf32> to vector<16x512xf32>
    %10 = arith.mulf %7, %9 : vector<16x512xf32>
    %11 = arith.truncf %10 : vector<16x512xf32> to vector<16x512xbf16>
    %c16 = arith.constant 16 : index
    %c0_6 = arith.constant 0 : index
    %12 = vector.load %arg6[%c16, %c0_6] : memref<144x512xbf16, #tpu.memory_space<vmem>>, vector<16x512xbf16>
    tpu.vector_store %arg6[%c16, %c0_6], %11 {strides = array<i32>} : memref<144x512xbf16, #tpu.memory_space<vmem>>, vector<16x512xbf16>,
    %c15_i32 = arith.constant 15 : i32
    %13 = tpu.dynamic_rotate %0 by %c15_i32 dim 1 : vector<16x512xf32>, i32 -> vector<16x512xf32>
    %c2 = arith.constant 2 : index
    %c0_7 = arith.constant 0 : index
    %14 = vector.load %arg2[%c2, %c0_7] : memref<9x512xf32, #tpu.memory_space<vmem>>, vector<1x512xf32>
    %15 = vector.broadcast %14 : vector<1x512xf32> to vector<16x512xf32>
    %16 = arith.mulf %13, %15 : vector<16x512xf32>
    %17 = arith.truncf %16 : vector<16x512xf32> to vector<16x512xbf16>
    %c32 = arith.constant 32 : index
    %c0_8 = arith.constant 0 : index
    %18 = vector.load %arg6[%c32, %c0_8] : memref<144x512xbf16, #tpu.memory_space<vmem>>, vector<16x512xbf16>
    tpu.vector_store %arg6[%c32, %c0_8], %17 {strides = array<i32>} : memref<144x512xbf16, #tpu.memory_space<vmem>>, vector<16x512xbf16>,
    %c1_i32 = arith.constant 1 : i32
    %19 = tpu.dynamic_rotate %0 by %c1_i32 dim 1 : vector<16x512xf32>, i32 -> vector<16x512xf32>
    %c3 = arith.constant 3 : index
    %c0_9 = arith.constant 0 : index
    %20 = vector.load %arg2[%c3, %c0_9] : memref<9x512xf32, #tpu.memory_space<vmem>>, vector<1x512xf32>
    %21 = vector.broadcast %20 : vector<1x512xf32> to vector<16x512xf32>
    %22 = arith.mulf %19, %21 : vector<16x512xf32>
    %23 = arith.truncf %22 : vector<16x512xf32> to vector<16x512xbf16>
    %c48 = arith.constant 48 : index
    %c0_10 = arith.constant 0 : index
    %24 = vector.load %arg6[%c48, %c0_10] : memref<144x512xbf16, #tpu.memory_space<vmem>>, vector<16x512xbf16>
    tpu.vector_store %arg6[%c48, %c0_10], %23 {strides = array<i32>} : memref<144x512xbf16, #tpu.memory_space<vmem>>, vector<16x512xbf16>,
    %25 = arith.truncf %0 : vector<16x512xf32> to vector<16x512xbf16>
    %c64 = arith.constant 64 : index
    %c0_11 = arith.constant 0 : index
    %26 = vector.load %arg6[%c64, %c0_11] : memref<144x512xbf16, #tpu.memory_space<vmem>>, vector<16x512xbf16>
    tpu.vector_store %arg6[%c64, %c0_11], %25 {strides = array<i32>} : memref<144x512xbf16, #tpu.memory_space<vmem>>, vector<16x512xbf16>,
    %c511_i32 = arith.constant 511 : i32
    %27 = tpu.dynamic_rotate %0 by %c511_i32 dim 1 : vector<16x512xf32>, i32 -> vector<16x512xf32>
    %c5 = arith.constant 5 : index
    %c0_12 = arith.constant 0 : index
    %28 = vector.load %arg2[%c5, %c0_12] : memref<9x512xf32, #tpu.memory_space<vmem>>, vector<1x512xf32>
    %29 = vector.broadcast %28 : vector<1x512xf32> to vector<16x512xf32>
    %30 = arith.mulf %27, %29 : vector<16x512xf32>
    %31 = arith.truncf %30 : vector<16x512xf32> to vector<16x512xbf16>
    %c80 = arith.constant 80 : index
    %c0_13 = arith.constant 0 : index
    %32 = vector.load %arg6[%c80, %c0_13] : memref<144x512xbf16, #tpu.memory_space<vmem>>, vector<16x512xbf16>
    tpu.vector_store %arg6[%c80, %c0_13], %31 {strides = array<i32>} : memref<144x512xbf16, #tpu.memory_space<vmem>>, vector<16x512xbf16>,
    %c497_i32 = arith.constant 497 : i32
    %33 = tpu.dynamic_rotate %0 by %c497_i32 dim 1 : vector<16x512xf32>, i32 -> vector<16x512xf32>
    %c6 = arith.constant 6 : index
    %c0_14 = arith.constant 0 : index
    %34 = vector.load %arg2[%c6, %c0_14] : memref<9x512xf32, #tpu.memory_space<vmem>>, vector<1x512xf32>
    %35 = vector.broadcast %34 : vector<1x512xf32> to vector<16x512xf32>
    %36 = arith.mulf %33, %35 : vector<16x512xf32>
    %37 = arith.truncf %36 : vector<16x512xf32> to vector<16x512xbf16>
    %c96 = arith.constant 96 : index
    %c0_15 = arith.constant 0 : index
    %38 = vector.load %arg6[%c96, %c0_15] : memref<144x512xbf16, #tpu.memory_space<vmem>>, vector<16x512xbf16>
    tpu.vector_store %arg6[%c96, %c0_15], %37 {strides = array<i32>} : memref<144x512xbf16, #tpu.memory_space<vmem>>, vector<16x512xbf16>,
    %c496_i32 = arith.constant 496 : i32
    %39 = tpu.dynamic_rotate %0 by %c496_i32 dim 1 : vector<16x512xf32>, i32 -> vector<16x512xf32>
    %c7 = arith.constant 7 : index
    %c0_16 = arith.constant 0 : index
    %40 = vector.load %arg2[%c7, %c0_16] : memref<9x512xf32, #tpu.memory_space<vmem>>, vector<1x512xf32>
    %41 = vector.broadcast %40 : vector<1x512xf32> to vector<16x512xf32>
    %42 = arith.mulf %39, %41 : vector<16x512xf32>
    %43 = arith.truncf %42 : vector<16x512xf32> to vector<16x512xbf16>
    %c112 = arith.constant 112 : index
    %c0_17 = arith.constant 0 : index
    %44 = vector.load %arg6[%c112, %c0_17] : memref<144x512xbf16, #tpu.memory_space<vmem>>, vector<16x512xbf16>
    tpu.vector_store %arg6[%c112, %c0_17], %43 {strides = array<i32>} : memref<144x512xbf16, #tpu.memory_space<vmem>>, vector<16x512xbf16>,
    %c495_i32 = arith.constant 495 : i32
    %45 = tpu.dynamic_rotate %0 by %c495_i32 dim 1 : vector<16x512xf32>, i32 -> vector<16x512xf32>
    %c8 = arith.constant 8 : index
    %c0_18 = arith.constant 0 : index
    %46 = vector.load %arg2[%c8, %c0_18] : memref<9x512xf32, #tpu.memory_space<vmem>>, vector<1x512xf32>
    %47 = vector.broadcast %46 : vector<1x512xf32> to vector<16x512xf32>
    %48 = arith.mulf %45, %47 : vector<16x512xf32>
    %49 = arith.truncf %48 : vector<16x512xf32> to vector<16x512xbf16>
    %c128 = arith.constant 128 : index
    %c0_19 = arith.constant 0 : index
    %50 = vector.load %arg6[%c128, %c0_19] : memref<144x512xbf16, #tpu.memory_space<vmem>>, vector<16x512xbf16>
    tpu.vector_store %arg6[%c128, %c0_19], %49 {strides = array<i32>} : memref<144x512xbf16, #tpu.memory_space<vmem>>, vector<16x512xbf16>,
    %c0_20 = arith.constant 0 : index
    %c0_21 = arith.constant 0 : index
    %51 = vector.load %arg3[%c0_20, %c0_21] : memref<16x144xbf16, #tpu.memory_space<vmem>>, vector<16x144xbf16>
    %c0_22 = arith.constant 0 : index
    %c0_23 = arith.constant 0 : index
    %52 = vector.load %arg6[%c0_22, %c0_23] : memref<144x512xbf16, #tpu.memory_space<vmem>>, vector<144x512xbf16>
    %cst = arith.constant dense<0.000000e+00> : vector<16x512xf32>
    %53 = tpu.matmul %51, %52, %cst {dimension_numbers = #tpu.dot_dimension_numbers<[1], [0], [0], [1], [0, 0, 1, 1], [], []>} : vector<16x144xbf16>, vector<144x512xbf16>, vector<16x512xf32> -> vector<16x512xf32>
    %c0_24 = arith.constant 0 : index
    %c0_25 = arith.constant 0 : index
    %54 = vector.load %arg4[%c0_24, %c0_25] : memref<16x1xf32, #tpu.memory_space<vmem>>, vector<16x1xf32>
    %55 = vector.broadcast %54 : vector<16x1xf32> to vector<16x512xf32>
    %56 = arith.addf %53, %55 : vector<16x512xf32>
    %cst_26 = arith.constant 0.000000e+00 : f32
    %57 = vector.broadcast %cst_26 : f32 to vector<16x512xf32>
    %58 = arith.maximumf %56, %57 : vector<16x512xf32>
    %cst_27 = arith.constant 2.000000e+00 : f32
    %59 = vector.broadcast %cst_27 : f32 to vector<16x512xf32>
    %60 = arith.mulf %59, %0 : vector<16x512xf32>
    %61 = arith.addf %58, %60 : vector<16x512xf32>
    %c0_28 = arith.constant 0 : index
    %c0_29 = arith.constant 0 : index
    %62 = vector.load %arg5[%c0_28, %c0_29] : memref<16x512xf32, #tpu.memory_space<vmem>>, vector<16x512xf32>
    tpu.vector_store %arg5[%c0_28, %c0_29], %61 {strides = array<i32>} : memref<16x512xf32, #tpu.memory_space<vmem>>, vector<16x512xf32>,
    return
  }
  func.func @transform_0(%arg0: i32) -> (i32, i32) {
    %c0_i32 = arith.constant 0 : i32
    %c0_i32_0 = arith.constant 0 : i32
    %c0_i32_1 = arith.constant 0 : i32
    return %c0_i32, %c0_i32_0 : i32, i32
  }
  func.func @transform_1(%arg0: i32) -> (i32, i32) {
    %c0_i32 = arith.constant 0 : i32
    %c0_i32_0 = arith.constant 0 : i32
    %c0_i32_1 = arith.constant 0 : i32
    return %c0_i32, %c0_i32_0 : i32, i32
  }
  func.func @transform_2(%arg0: i32) -> (i32, i32) {
    %c0_i32 = arith.constant 0 : i32
    %c0_i32_0 = arith.constant 0 : i32
    %c0_i32_1 = arith.constant 0 : i32
    return %c0_i32, %c0_i32_0 : i32, i32
  }
  func.func @transform_3(%arg0: i32) -> (i32, i32) {
    %c0_i32 = arith.constant 0 : i32
    %c0_i32_0 = arith.constant 0 : i32
    %c0_i32_1 = arith.constant 0 : i32
    return %c0_i32, %c0_i32_0 : i32, i32
  }
  func.func @transform_4(%arg0: i32) -> (i32, i32) {
    %c0_i32 = arith.constant 0 : i32
    %c0_i32_0 = arith.constant 0 : i32
    %c0_i32_1 = arith.constant 0 : i32
    return %c0_i32, %c0_i32_0 : i32, i32
  }
}

</mosaic_0001>

<bundles_post_ra>
// kernel: tpu_custom_call.1
= control target key start
LH: loop header
LB: loop body
LE: loop exit
PB: predicated region body
PF: predicated region fallthrough
CT: control target
= control target key end

     0   :  { %9 = vsyncpa [#allocation4], 0  ;;  %s1248_s0 = inlined_call_operand.hbm [shape: f32[16,512], index: 0, kind: input, shape index: {}]   ;;  %s1249_s1 = inlined_call_operand.hbm [shape: f32[9,512], index: 1, kind: input, shape index: {}]   ;;  %s1250_s2 = inlined_call_operand.vmem [shape: bf16[16,144], index: 2, kind: input, shape index: {}]   ;;  %s1251_s3 = inlined_call_operand.vmem [shape: f32[16,1], index: 3, kind: input, shape index: {}]   ;;  %s1252_s4 = inlined_call_operand.hbm [shape: f32[16,512], index: 4, kind: output, shape index: {}]  }
   0x1   :  { %10 = vsyncpa [#allocation7], 0 }
   0x2   :  { %11 = vsyncpa [#allocation5], 0  ;;  %s870_s15 = smov [#allocation3]   ;;  %s798_s19 = scalar_lea.hbm %s1248_s0, 1024 }
   0x3   :  { %s17_s16 = sshll.u32 %s870_s15, 4  ;;  %p799_p0 = scmp.ne.s32.totalorder %s1248_s0, %s798_s19  ;;  %s18_s16 = int_to_ptr.vmem [resolvable:$true] %s17_s16 }
   0x4   :  { %p802_p1 = scmp.lt.u32.totalorder %s798_s19, %s1248_s0 }
   0x6   :  { %p804_p2 = pnand %p802_p1, %p799_p0 }
   0x8   :  { %807 = shalt.err (!%p804_p2)
}
   0x9   :  { %s808_s24 = scalar_lea.vmem %s18_s16, 1024  ;;  %p813_p4 = scmp.lt.s32.totalorder %s18_s16, %s18_s16 }
   0xa   :  { %p809_p3 = scmp.ne.s32.totalorder %s18_s16, %s808_s24  ;;  %p814_p5 = scmp.lt.s32.totalorder %s808_s24, %s808_s24 }
   0xc   :  { %p815_p6 = por %p814_p5, %p813_p4 }
   0xe   :  { %p816_p7 = pnand %p815_p6, %p809_p3 }
  0x10   :  { %819 = shalt.err (!%p816_p7)
}
  0x11   :  { %s871_s25 = smov 512   ;;  %s872_s26 = smov 32  }
  0x12   :  { %23 = dma.hbm_to_vmem [thread:$0]  %s1248_s0, 1024, %s18_s16, [#allocation4], %s871_s25, %s871_s25, %s872_s26  }
  0x13   :  { %s873_s29 = smov [#allocation6]   ;;  %s820_s7 = scalar_lea.hbm %s1249_s1, 1024 }
  0x14   :  { %s29_s30 = sshll.u32 %s873_s29, 4  ;;  %p821_p8 = scmp.ne.s32.totalorder %s1249_s1, %s820_s7  ;;  %s30_s30 = int_to_ptr.vmem [resolvable:$true] %s29_s30 }
  0x15   :  { %p824_p9 = scmp.lt.u32.totalorder %s820_s7, %s1249_s1 }
  0x17   :  { %p826_p10 = pnand %p824_p9, %p821_p8 }
  0x19   :  { %829 = shalt.err (!%p826_p10)
}
  0x1a   :  { %s830_s12 = scalar_lea.vmem %s30_s30, 1024  ;;  %p835_p12 = scmp.lt.s32.totalorder %s30_s30, %s30_s30 }
  0x1b   :  { %p831_p11 = scmp.ne.s32.totalorder %s30_s30, %s830_s12  ;;  %p836_p13 = scmp.lt.s32.totalorder %s830_s12, %s830_s12 }
  0x1d   :  { %p837_p0 = por %p836_p13, %p835_p12 }
  0x1f   :  { %p838_p1 = pnand %p837_p0, %p831_p11 }
  0x21   :  { %841 = shalt.err (!%p838_p1)
}
  0x22   :  { %35 = dma.hbm_to_vmem [thread:$0]  %s1249_s1, 1024, %s30_s30, [#allocation7], %s871_s25, %s871_s25, %s872_s26  }
  0x23   :  { %864 = dma.done.wait [#allocation4], 1024  }
  0x24   :  { %865 = vsyncadd [#allocation4], 4294966272 }
  0x25   :  { %866 = dma.done.wait [#allocation7], 1024  }
  0x26   :  { %867 = vsyncadd [#allocation7], 4294966272  ;;  %v939_v0 = vld [vmem:[#allocation3 + $0x8] sm:$0xff]  ;;  %v941_v1 = vld [vmem:[#allocation3] sm:$0xff]  ;;  %s874_s14 = smov 17   ;;  %s875_s1 = smov 16   ;;  %v71_v8 = vlaneseq }
  0x27   :  { %59 = vrot.lane.b32.xlu1 %v939_v0, %s874_s14  ;;  %55 = vrot.lane.b32.xlu0 %v941_v1, %s874_s14  ;;  %v945_v2 = vld [vmem:[#allocation3 + $0x28] sm:$0xff]  ;;  %v947_v3 = vld [vmem:[#allocation3 + $0x20] sm:$0xff]  ;;  %v951_v4 = vld [vmem:[#allocation3 + $0x30] sm:$0xff]  ;;  %s876_s15 = smov 15   ;;  %s877_s16 = smov 1   ;;  %vm635_vm0 = vcmask 130048  }
  0x28   :  { %v953_v5 = vld [vmem:[#allocation3 + $0x10] sm:$0xff]  ;;  %v957_v6 = vld [vmem:[#allocation3 + $0x38] sm:$0xff]  ;;  %s878_s17 = smov 127   ;;  %s879_s18 = smov 113   ;;  %v85_v9 = vshrl.u32 %v71_v8, 7  ;;  %v1011_v10 = vand.u32 127, %v71_v8 }
  0x29   :  { %v959_v7 = vld [vmem:[#allocation3 + $0x18] sm:$0xff]  ;;  %s880_s19 = smov 112   ;;  %s881_s20 = smov 111   ;;  %v797_v13 = vld [vmem:[%s1250_s2 + $0x4] ss:$8 sps:$4 sm:$0xff]   ;;  %v882_v26 = vmov 0  }
  0x2a   :  { %v1017_v11 = vsub.s32 1, %v85_v9  ;;  %v82_v12 = vld [vmem:[#allocation6] ss:$8 sm:$0xf]  ;;  %vm73_vm1 = vcmp.lt.s32.totalorder %v1011_v10, 17  ;;  %777 = vmatprep.mubr.msk.bf16.mxu0 %vm635_vm0, %v797_v13  ;;  %778 = vmatprep.mubr.msk.bf16.mxu1 %vm635_vm0, %v797_v13  ;;  %v1030_v20 = vsub.s32 2, %v85_v9 }
  0x2b   :  { %61 = vrot.lane.b32.xlu1 %v945_v2, %s874_s14  ;;  %57 = vrot.lane.b32.xlu0 %v947_v3, %s874_s14  ;;  %v1034_v22 = vsub.s32 0, %v85_v9  ;;  %v1040_v25 = vsub.s32 3, %v85_v9  ;;  %v615_v35 = vld [vmem:[%s1251_s3 + $0x8] sm:$0xff]  ;;  %v614_v40 = vld [vmem:[%s1251_s3] sm:$0xff]  ;;  %vm136_vm2 = vcmp.lt.s32.totalorder %v1011_v10, 16  ;;  %vm200_vm3 = vcmp.lt.s32.totalorder %v1011_v10, 15 }
  0x2c   :  { %v91_v16 = vrot.slane %v82_v12, %v1017_v11  ;;  %794 = vset.pattern.permute.xlu1 %v882_v26  ;;  %793 = vset.pattern.permute.xlu0 %v882_v26  ;;  %v95_v27 = vrot.slane %v82_v12, %v1030_v20  ;;  %v146_v49 = vld [vmem:[#allocation6 + $0x1] ss:$8 sm:$0xf]  ;;  %vm264_vm4 = vcmp.lt.s32.totalorder %v1011_v10, 1  ;;  %vm336_vm5 = vcmp.lt.s32.totalorder %v1011_v10, 127 }
  0x2d   :  { %v87_v33 = vrot.slane %v82_v12, %v1034_v22  ;;  %v99_v34 = vrot.slane %v82_v12, %v1040_v25  ;;  %v155_v55 = vrot.slane %v146_v49, %v1017_v11  ;;  %v159_v62 = vrot.slane %v146_v49, %v1030_v20 }
  0x2e   :  { %vm400_vm6 = vcmp.lt.s32.totalorder %v1011_v10, 113  ;;  %vm464_vm7 = vcmp.lt.s32.totalorder %v1011_v10, 112  ;;  %vm528_vm8 = vcmp.lt.s32.totalorder %v1011_v10, 111 }
  0x2f   :  { %65 = vrot.lane.b32.xlu1 %v951_v4, %s874_s14  ;;  %63 = vrot.lane.b32.xlu0 %v953_v5, %s874_s14 }
  0x33   :  { %69 = vrot.lane.b32.xlu1 %v957_v6, %s874_s14  ;;  %67 = vrot.lane.b32.xlu0 %v959_v7, %s874_s14 }
  0x37   :  { %122 = vrot.lane.b32.xlu1 %v947_v3, %s875_s1  ;;  %120 = vrot.lane.b32.xlu0 %v941_v1, %s875_s1 }
  0x3b   :  { %126 = vrot.lane.b32.xlu1 %v945_v2, %s875_s1  ;;  %124 = vrot.lane.b32.xlu0 %v939_v0, %s875_s1 }
  0x3f   :  { %130 = vrot.lane.b32.xlu1 %v951_v4, %s875_s1  ;;  %128 = vrot.lane.b32.xlu0 %v953_v5, %s875_s1 }
  0x43   :  { %134 = vrot.lane.b32.xlu1 %v957_v6, %s875_s1  ;;  %132 = vrot.lane.b32.xlu0 %v959_v7, %s875_s1 }
  0x47   :  { %186 = vrot.lane.b32.xlu1 %v947_v3, %s876_s15  ;;  %184 = vrot.lane.b32.xlu0 %v941_v1, %s876_s15 }
  0x4b   :  { %190 = vrot.lane.b32.xlu1 %v945_v2, %s876_s15  ;;  %188 = vrot.lane.b32.xlu0 %v939_v0, %s876_s15 }
  0x4f   :  { %194 = vrot.lane.b32.xlu1 %v951_v4, %s876_s15  ;;  %192 = vrot.lane.b32.xlu0 %v953_v5, %s876_s15 }
  0x53   :  { %198 = vrot.lane.b32.xlu1 %v957_v6, %s876_s15  ;;  %196 = vrot.lane.b32.xlu0 %v959_v7, %s876_s15 }
  0x57   :  { %250 = vrot.lane.b32.xlu1 %v947_v3, %s877_s16  ;;  %248 = vrot.lane.b32.xlu0 %v941_v1, %s877_s16 }
  0x5b   :  { %254 = vrot.lane.b32.xlu1 %v945_v2, %s877_s16  ;;  %252 = vrot.lane.b32.xlu0 %v939_v0, %s877_s16 }
  0x5f   :  { %258 = vrot.lane.b32.xlu1 %v951_v4, %s877_s16  ;;  %256 = vrot.lane.b32.xlu0 %v953_v5, %s877_s16 }
  0x63   :  { %262 = vrot.lane.b32.xlu1 %v957_v6, %s877_s16  ;;  %260 = vrot.lane.b32.xlu0 %v959_v7, %s877_s16 }
  0x67   :  { %322 = vrot.lane.b32.xlu1 %v947_v3, %s878_s17  ;;  %320 = vrot.lane.b32.xlu0 %v941_v1, %s878_s17 }
  0x6b   :  { %326 = vrot.lane.b32.xlu1 %v945_v2, %s878_s17  ;;  %324 = vrot.lane.b32.xlu0 %v939_v0, %s878_s17 }
  0x6f   :  { %330 = vrot.lane.b32.xlu1 %v951_v4, %s878_s17  ;;  %328 = vrot.lane.b32.xlu0 %v953_v5, %s878_s17 }
  0x73   :  { %334 = vrot.lane.b32.xlu1 %v957_v6, %s878_s17  ;;  %332 = vrot.lane.b32.xlu0 %v959_v7, %s878_s17 }
  0x77   :  { %386 = vrot.lane.b32.xlu1 %v947_v3, %s879_s18  ;;  %384 = vrot.lane.b32.xlu0 %v941_v1, %s879_s18 }
  0x7b   :  { %390 = vrot.lane.b32.xlu1 %v945_v2, %s879_s18  ;;  %388 = vrot.lane.b32.xlu0 %v939_v0, %s879_s18 }
  0x7f   :  { %394 = vrot.lane.b32.xlu1 %v951_v4, %s879_s18  ;;  %392 = vrot.lane.b32.xlu0 %v953_v5, %s879_s18 }
  0x83   :  { %398 = vrot.lane.b32.xlu1 %v957_v6, %s879_s18  ;;  %396 = vrot.lane.b32.xlu0 %v959_v7, %s879_s18 }
  0x87   :  { %450 = vrot.lane.b32.xlu1 %v947_v3, %s880_s19  ;;  %448 = vrot.lane.b32.xlu0 %v941_v1, %s880_s19 }
  0x8b   :  { %454 = vrot.lane.b32.xlu1 %v945_v2, %s880_s19  ;;  %452 = vrot.lane.b32.xlu0 %v939_v0, %s880_s19 }
  0x8f   :  { %458 = vrot.lane.b32.xlu1 %v951_v4, %s880_s19  ;;  %456 = vrot.lane.b32.xlu0 %v953_v5, %s880_s19 }
  0x93   :  { %462 = vrot.lane.b32.xlu1 %v957_v6, %s880_s19  ;;  %460 = vrot.lane.b32.xlu0 %v959_v7, %s880_s19 }
  0x97   :  { %514 = vrot.lane.b32.xlu1 %v947_v3, %s881_s20  ;;  %512 = vrot.lane.b32.xlu0 %v941_v1, %s881_s20 }
  0x99   :  { %v60_v14 = vpop.permute.xlu1 %59  ;;  %v56_v15 = vpop.permute.xlu0 %55 }
  0x9a   :  { %v78_v17 = vsel %vm73_vm1, %v56_v15, %v60_v14 }
  0x9b   :  { %518 = vrot.lane.b32.xlu1 %v945_v2, %s881_s20  ;;  %516 = vrot.lane.b32.xlu0 %v939_v0, %s881_s20  ;;  %v105_v23 = vmul.f32 %v91_v16, %v78_v17 }
  0x9d   :  { %v62_v18 = vpop.permute.xlu1 %61  ;;  %v58_v19 = vpop.permute.xlu0 %57 }
  0x9e   :  { %v79_v21 = vsel %vm73_vm1, %v58_v19, %v62_v18 }
  0x9f   :  { %522 = vrot.lane.b32.xlu1 %v951_v4, %s881_s20  ;;  %520 = vrot.lane.b32.xlu0 %v953_v5, %s881_s20  ;;  %v109_v24 = vmul.f32 %v91_v16, %v79_v21 }
  0xa1   :  { %v66_v28 = vpop.permute.xlu1 %65  ;;  %v64_v29 = vpop.permute.xlu0 %63  ;;  %v113_v30 = vpack.c.bf16 %v109_v24, %v105_v23 }
  0xa2   :  { %v77_v31 = vsel %vm73_vm1, %v62_v18, %v66_v28  ;;  %v76_v32 = vsel %vm73_vm1, %v60_v14, %v64_v29  ;;  %v151_v14 = vrot.slane %v146_v49, %v1034_v22 }
  0xa3   :  { %526 = vrot.lane.b32.xlu1 %v957_v6, %s881_s20  ;;  %524 = vrot.lane.b32.xlu0 %v959_v7, %s881_s20  ;;  %v110_v36 = vmul.f32 %v95_v27, %v77_v31  ;;  %v106_v37 = vmul.f32 %v95_v27, %v76_v32  ;;  %v210_v31 = vld [vmem:[#allocation6 + $0x2] ss:$8 sm:$0xf] }
  0xa4   :  { %639 = vmatprep.subr.bf16.mxu0 %v113_v30 }
  0xa5   :  { %v70_v38 = vpop.permute.xlu1 %69  ;;  %v68_v39 = vpop.permute.xlu0 %67  ;;  %v114_v54 = vpack.c.bf16 %v110_v36, %v106_v37  ;;  %v219_v37 = vrot.slane %v210_v31, %v1017_v11 }
  0xa6   :  { %v75_v41 = vsel %vm73_vm1, %v66_v28, %v70_v38  ;;  %v81_v42 = vsel %vm73_vm1, %v70_v38, %v58_v19  ;;  %v74_v43 = vsel %vm73_vm1, %v64_v29, %v68_v39  ;;  %v80_v44 = vsel %vm73_vm1, %v68_v39, %v56_v15 }
  0xa7   :  { %v108_v45 = vmul.f32 %v87_v33, %v81_v42  ;;  %v104_v46 = vmul.f32 %v87_v33, %v80_v44  ;;  %v107_v47 = vmul.f32 %v99_v34, %v74_v43  ;;  %v111_v48 = vmul.f32 %v99_v34, %v75_v41  ;;  %623 = vperm.xlu1 %794, %v615_v35  }
  0xa8   :  { %618 = vperm.xlu0 %793, %v614_v40   ;;  %v163_v15 = vrot.slane %v146_v49, %v1040_v25  ;;  %v223_v44 = vrot.slane %v210_v31, %v1030_v20 }
  0xa9   :  { %v123_v50 = vpop.permute.xlu1 %122  ;;  %v121_v51 = vpop.permute.xlu0 %120  ;;  %v112_v52 = vpack.c.bf16 %v108_v45, %v104_v46  ;;  %v115_v53 = vpack.c.bf16 %v111_v48, %v107_v47 }
  0xab   :  { %640 = vmatpush1.bf16.msra.mxu0 %v112_v52  ;;  %682 = vmatprep.subr.bf16.mxu1 %v115_v53 }
  0xac   :  { %683 = vmatpush1.bf16.msra.mxu1 %v114_v54 }
  0xad   :  { %v127_v56 = vpop.permute.xlu1 %126  ;;  %v125_v57 = vpop.permute.xlu0 %124 }
  0xae   :  { %v142_v58 = vsel %vm136_vm2, %v123_v50, %v127_v56  ;;  %v141_v59 = vsel %vm136_vm2, %v121_v51, %v125_v57 }
  0xaf   :  { %v173_v60 = vmul.f32 %v155_v55, %v142_v58  ;;  %v169_v61 = vmul.f32 %v155_v55, %v141_v59 }
  0xb1   :  { %v131_v63 = vpop.permute.xlu1 %130  ;;  %v129_v8 = vpop.permute.xlu0 %128  ;;  %v177_v9 = vpack.c.bf16 %v173_v60, %v169_v61 }
  0xb2   :  { %v140_v12 = vsel %vm136_vm2, %v127_v56, %v131_v63  ;;  %v139_v13 = vsel %vm136_vm2, %v125_v57, %v129_v8 }
  0xb3   :  { %641 = vmatprep.subr.bf16.mxu0 %v177_v9  ;;  %v174_v16 = vmul.f32 %v159_v62, %v140_v12  ;;  %v170_v17 = vmul.f32 %v159_v62, %v139_v13 }
  0xb5   :  { %v135_v18 = vpop.permute.xlu1 %134  ;;  %v133_v19 = vpop.permute.xlu0 %132  ;;  %v178_v36 = vpack.c.bf16 %v174_v16, %v170_v17 }
  0xb6   :  { %v138_v21 = vsel %vm136_vm2, %v131_v63, %v135_v18  ;;  %v144_v23 = vsel %vm136_vm2, %v135_v18, %v123_v50  ;;  %v137_v24 = vsel %vm136_vm2, %v129_v8, %v133_v19  ;;  %v143_v26 = vsel %vm136_vm2, %v133_v19, %v121_v51  ;;  %v274_v8 = vld [vmem:[#allocation6 + $0x3] ss:$8 sm:$0xf] }
  0xb7   :  { %v172_v27 = vmul.f32 %v151_v14, %v144_v23  ;;  %v175_v28 = vmul.f32 %v163_v15, %v138_v21  ;;  %v168_v29 = vmul.f32 %v151_v14, %v143_v26  ;;  %v171_v30 = vmul.f32 %v163_v15, %v137_v24 }
  0xb8   :  { %v215_v50 = vrot.slane %v210_v31, %v1034_v22  ;;  %v227_v51 = vrot.slane %v210_v31, %v1040_v25  ;;  %v283_v16 = vrot.slane %v274_v8, %v1017_v11  ;;  %v287_v26 = vrot.slane %v274_v8, %v1030_v20 }
  0xb9   :  { %v187_v32 = vpop.permute.xlu1 %186  ;;  %v185_v33 = vpop.permute.xlu0 %184  ;;  %v176_v34 = vpack.c.bf16 %v172_v27, %v168_v29  ;;  %v179_v35 = vpack.c.bf16 %v175_v28, %v171_v30 }
  0xbb   :  { %642 = vmatpush1.bf16.msra.mxu0 %v176_v34  ;;  %684 = vmatprep.subr.bf16.mxu1 %v179_v35 }
  0xbc   :  { %685 = vmatpush1.bf16.msra.mxu1 %v178_v36 }
  0xbd   :  { %v191_v38 = vpop.permute.xlu1 %190  ;;  %v189_v39 = vpop.permute.xlu0 %188 }
  0xbe   :  { %v206_v40 = vsel %vm200_vm3, %v187_v32, %v191_v38  ;;  %v205_v41 = vsel %vm200_vm3, %v185_v33, %v189_v39 }
  0xbf   :  { %v237_v42 = vmul.f32 %v219_v37, %v206_v40  ;;  %v233_v43 = vmul.f32 %v219_v37, %v205_v41 }
  0xc1   :  { %v195_v45 = vpop.permute.xlu1 %194  ;;  %v193_v46 = vpop.permute.xlu0 %192  ;;  %v241_v47 = vpack.c.bf16 %v237_v42, %v233_v43 }
  0xc2   :  { %v204_v48 = vsel %vm200_vm3, %v191_v38, %v195_v45  ;;  %v203_v49 = vsel %vm200_vm3, %v189_v39, %v193_v46 }
  0xc3   :  { %643 = vmatprep.subr.bf16.mxu0 %v241_v47  ;;  %v238_v52 = vmul.f32 %v223_v44, %v204_v48  ;;  %v234_v53 = vmul.f32 %v223_v44, %v203_v49 }
  0xc5   :  { %v199_v54 = vpop.permute.xlu1 %198  ;;  %v197_v55 = vpop.permute.xlu0 %196  ;;  %v242_v15 = vpack.c.bf16 %v238_v52, %v234_v53  ;;  %v346_v53 = vld [vmem:[#allocation6 + $0x5] ss:$8 sm:$0xf] }
  0xc6   :  { %v202_v56 = vsel %vm200_vm3, %v195_v45, %v199_v54  ;;  %v208_v57 = vsel %vm200_vm3, %v199_v54, %v187_v32  ;;  %v201_v58 = vsel %vm200_vm3, %v193_v46, %v197_v55  ;;  %v207_v59 = vsel %vm200_vm3, %v197_v55, %v185_v33 }
  0xc7   :  { %v236_v60 = vmul.f32 %v215_v50, %v208_v57  ;;  %v239_v61 = vmul.f32 %v227_v51, %v202_v56  ;;  %v232_v62 = vmul.f32 %v215_v50, %v207_v59  ;;  %v235_v63 = vmul.f32 %v227_v51, %v201_v58 }
  0xc8   :  { %v279_v32 = vrot.slane %v274_v8, %v1034_v22  ;;  %v291_v33 = vrot.slane %v274_v8, %v1040_v25  ;;  %v313_v46 = vpack.c.bf16 %v945_v2, %v939_v0  ;;  %v315_v51 = vpack.c.bf16 %v957_v6, %v959_v7 }
  0xc9   :  { %v251_v9 = vpop.permute.xlu1 %250  ;;  %v249_v12 = vpop.permute.xlu0 %248  ;;  %v240_v13 = vpack.c.bf16 %v236_v60, %v232_v62  ;;  %v243_v14 = vpack.c.bf16 %v239_v61, %v235_v63  ;;  %v312_v54 = vpack.c.bf16 %v947_v3, %v941_v1  ;;  %v314_v55 = vpack.c.bf16 %v951_v4, %v953_v5 }
  0xca   :  { %v351_v56 = vrot.slane %v346_v53, %v1034_v22  ;;  %v355_v61 = vrot.slane %v346_v53, %v1017_v11 }
  0xcb   :  { %644 = vmatpush1.bf16.msra.mxu0 %v240_v13  ;;  %686 = vmatprep.subr.bf16.mxu1 %v243_v14 }
  0xcc   :  { %687 = vmatpush1.bf16.msra.mxu1 %v242_v15 }
  0xcd   :  { %v255_v17 = vpop.permute.xlu1 %254  ;;  %v253_v18 = vpop.permute.xlu0 %252 }
  0xce   :  { %v270_v19 = vsel %vm264_vm4, %v251_v9, %v255_v17  ;;  %v269_v21 = vsel %vm264_vm4, %v249_v12, %v253_v18 }
  0xcf   :  { %v301_v23 = vmul.f32 %v283_v16, %v270_v19  ;;  %v297_v24 = vmul.f32 %v283_v16, %v269_v21  ;;  %v359_v16 = vrot.slane %v346_v53, %v1030_v20 }
  0xd1   :  { %v259_v27 = vpop.permute.xlu1 %258  ;;  %v257_v28 = vpop.permute.xlu0 %256  ;;  %v305_v29 = vpack.c.bf16 %v301_v23, %v297_v24 }
  0xd2   :  { %v268_v30 = vsel %vm264_vm4, %v255_v17, %v259_v27  ;;  %v267_v31 = vsel %vm264_vm4, %v253_v18, %v257_v28  ;;  %v363_v17 = vrot.slane %v346_v53, %v1040_v25 }
  0xd3   :  { %645 = vmatprep.subr.bf16.mxu0 %v305_v29  ;;  %v302_v34 = vmul.f32 %v287_v26, %v268_v30  ;;  %v298_v35 = vmul.f32 %v287_v26, %v267_v31 }
  0xd5   :  { %v263_v36 = vpop.permute.xlu1 %262  ;;  %v261_v37 = vpop.permute.xlu0 %260  ;;  %v306_v52 = vpack.c.bf16 %v302_v34, %v298_v35 }
  0xd6   :  { %v266_v38 = vsel %vm264_vm4, %v259_v27, %v263_v36  ;;  %v272_v39 = vsel %vm264_vm4, %v263_v36, %v251_v9  ;;  %v265_v40 = vsel %vm264_vm4, %v257_v28, %v261_v37  ;;  %v271_v41 = vsel %vm264_vm4, %v261_v37, %v249_v12  ;;  %v410_v37 = vld [vmem:[#allocation6 + $0x6] ss:$8 sm:$0xf] }
  0xd7   :  { %v300_v42 = vmul.f32 %v279_v32, %v272_v39  ;;  %v303_v43 = vmul.f32 %v291_v33, %v266_v38  ;;  %v296_v44 = vmul.f32 %v279_v32, %v271_v41  ;;  %v299_v45 = vmul.f32 %v291_v33, %v265_v40 }
  0xd8   :  { %v415_v38 = vrot.slane %v410_v37, %v1034_v22  ;;  %v427_v53 = vrot.slane %v410_v37, %v1040_v25 }
  0xd9   :  { %v323_v47 = vpop.permute.xlu1 %322  ;;  %v321_v48 = vpop.permute.xlu0 %320  ;;  %v304_v49 = vpack.c.bf16 %v300_v42, %v296_v44  ;;  %v307_v50 = vpack.c.bf16 %v303_v43, %v299_v45  ;;  %v419_v43 = vrot.slane %v410_v37, %v1017_v11 }
  0xdb   :  { %646 = vmatpush1.bf16.msra.mxu0 %v304_v49  ;;  %688 = vmatprep.subr.bf16.mxu1 %v307_v50 }
  0xdc   :  { %689 = vmatpush1.bf16.msra.mxu1 %v306_v52  ;;  %647 = vmatprep.subr.bf16.mxu0 %v313_v46  ;;  %v423_v52 = vrot.slane %v410_v37, %v1030_v20 }
  0xdd   :  { %v327_v57 = vpop.permute.xlu1 %326  ;;  %v325_v58 = vpop.permute.xlu0 %324  ;;  %690 = vmatprep.subr.bf16.mxu1 %v315_v51 }
  0xde   :  { %v342_v59 = vsel %vm336_vm5, %v323_v47, %v327_v57  ;;  %v341_v60 = vsel %vm336_vm5, %v321_v48, %v325_v58 }
  0xdf   :  { %648 = vmatpush1.bf16.msra.mxu0 %v312_v54  ;;  %v372_v62 = vmul.f32 %v351_v56, %v342_v59  ;;  %v368_v63 = vmul.f32 %v351_v56, %v341_v60 }
  0xe0   :  { %691 = vmatpush1.bf16.msra.mxu1 %v314_v55 }
  0xe1   :  { %v331_v8 = vpop.permute.xlu1 %330  ;;  %v329_v9 = vpop.permute.xlu0 %328  ;;  %v376_v23 = vpack.c.bf16 %v372_v62, %v368_v63 }
  0xe2   :  { %v340_v12 = vsel %vm336_vm5, %v327_v57, %v331_v8  ;;  %v339_v13 = vsel %vm336_vm5, %v325_v58, %v329_v9 }
  0xe3   :  { %v373_v14 = vmul.f32 %v355_v61, %v340_v12  ;;  %v369_v15 = vmul.f32 %v355_v61, %v339_v13 }
  0xe5   :  { %v335_v18 = vpop.permute.xlu1 %334  ;;  %v333_v19 = vpop.permute.xlu0 %332  ;;  %v377_v21 = vpack.c.bf16 %v373_v14, %v369_v15 }
  0xe6   :  { %v338_v24 = vsel %vm336_vm5, %v331_v8, %v335_v18  ;;  %v344_v26 = vsel %vm336_vm5, %v335_v18, %v323_v47  ;;  %v337_v27 = vsel %vm336_vm5, %v329_v9, %v333_v19  ;;  %v343_v28 = vsel %vm336_vm5, %v333_v19, %v321_v48 }
  0xe7   :  { %v374_v29 = vmul.f32 %v359_v16, %v338_v24  ;;  %v375_v30 = vmul.f32 %v363_v17, %v344_v26  ;;  %v370_v31 = vmul.f32 %v359_v16, %v337_v27  ;;  %v371_v32 = vmul.f32 %v363_v17, %v343_v28  ;;  %649 = vmatprep.subr.bf16.mxu0 %v377_v21  ;;  %v474_v16 = vld [vmem:[#allocation6 + $0x7] ss:$8 sm:$0xf] }
  0xe8   :  { %650 = vmatpush1.bf16.msra.mxu0 %v376_v23  ;;  %v479_v17 = vrot.slane %v474_v16, %v1034_v22  ;;  %v483_v24 = vrot.slane %v474_v16, %v1017_v11 }
  0xe9   :  { %v387_v33 = vpop.permute.xlu1 %386  ;;  %v385_v34 = vpop.permute.xlu0 %384  ;;  %v379_v35 = vpack.c.bf16 %v375_v30, %v371_v32  ;;  %v378_v36 = vpack.c.bf16 %v374_v29, %v370_v31 }
  0xeb   :  { %692 = vmatprep.subr.bf16.mxu1 %v379_v35  ;;  %v491_v35 = vrot.slane %v474_v16, %v1040_v25 }
  0xec   :  { %693 = vmatpush1.bf16.msra.mxu1 %v378_v36 }
  0xed   :  { %v391_v39 = vpop.permute.xlu1 %390  ;;  %v389_v40 = vpop.permute.xlu0 %388 }
  0xee   :  { %v406_v41 = vsel %vm400_vm6, %v387_v33, %v391_v39  ;;  %v405_v42 = vsel %vm400_vm6, %v385_v34, %v389_v40 }
  0xef   :  { %v436_v44 = vmul.f32 %v415_v38, %v406_v41  ;;  %v432_v45 = vmul.f32 %v415_v38, %v405_v42 }
  0xf1   :  { %v395_v46 = vpop.permute.xlu1 %394  ;;  %v393_v47 = vpop.permute.xlu0 %392  ;;  %v440_v57 = vpack.c.bf16 %v436_v44, %v432_v45 }
  0xf2   :  { %v404_v48 = vsel %vm400_vm6, %v391_v39, %v395_v46  ;;  %v403_v49 = vsel %vm400_vm6, %v389_v40, %v393_v47 }
  0xf3   :  { %v437_v50 = vmul.f32 %v419_v43, %v404_v48  ;;  %v433_v51 = vmul.f32 %v419_v43, %v403_v49 }
  0xf5   :  { %v399_v54 = vpop.permute.xlu1 %398  ;;  %v397_v55 = vpop.permute.xlu0 %396  ;;  %v441_v56 = vpack.c.bf16 %v437_v50, %v433_v51 }
  0xf6   :  { %v402_v58 = vsel %vm400_vm6, %v395_v46, %v399_v54  ;;  %v408_v59 = vsel %vm400_vm6, %v399_v54, %v387_v33  ;;  %v401_v60 = vsel %vm400_vm6, %v393_v47, %v397_v55  ;;  %v407_v61 = vsel %vm400_vm6, %v397_v55, %v385_v34 }
  0xf7   :  { %v438_v62 = vmul.f32 %v423_v52, %v402_v58  ;;  %v439_v63 = vmul.f32 %v427_v53, %v408_v59  ;;  %v434_v8 = vmul.f32 %v423_v52, %v401_v60  ;;  %v435_v9 = vmul.f32 %v427_v53, %v407_v61  ;;  %651 = vmatprep.subr.bf16.mxu0 %v441_v56  ;;  %v538_v52 = vld [vmem:[#allocation6 + $0x20] ss:$8 sm:$0xf] }
  0xf8   :  { %652 = vmatpush1.bf16.msra.mxu0 %v440_v57  ;;  %v487_v34 = vrot.slane %v474_v16, %v1030_v20  ;;  %v543_v53 = vrot.slane %v538_v52, %v1034_v22  ;;  %v547_v58 = vrot.slane %v538_v52, %v1017_v11 }
  0xf9   :  { %v451_v12 = vpop.permute.xlu1 %450  ;;  %v449_v13 = vpop.permute.xlu0 %448  ;;  %v443_v14 = vpack.c.bf16 %v439_v63, %v435_v9  ;;  %v442_v15 = vpack.c.bf16 %v438_v62, %v434_v8 }
  0xfb   :  { %694 = vmatprep.subr.bf16.mxu1 %v443_v14 }
  0xfc   :  { %695 = vmatpush1.bf16.msra.mxu1 %v442_v15 }
  0xfd   :  { %v455_v18 = vpop.permute.xlu1 %454  ;;  %v453_v19 = vpop.permute.xlu0 %452 }
  0xfe   :  { %v470_v21 = vsel %vm464_vm7, %v451_v12, %v455_v18  ;;  %v469_v23 = vsel %vm464_vm7, %v449_v13, %v453_v19 }
  0xff   :  { %v500_v26 = vmul.f32 %v479_v17, %v470_v21  ;;  %v496_v27 = vmul.f32 %v479_v17, %v469_v23 }
 0x101   :  { %v459_v28 = vpop.permute.xlu1 %458  ;;  %v457_v29 = vpop.permute.xlu0 %456  ;;  %v504_v39 = vpack.c.bf16 %v500_v26, %v496_v27  ;;  %v795_v26 = vld [vmem:[%s1250_s2] ss:$8 sps:$4 sm:$0xff]   ;;  %s883_s2 = smov [#allocation8]  }
 0x102   :  { %v468_v30 = vsel %vm464_vm7, %v455_v18, %v459_v28  ;;  %v467_v31 = vsel %vm464_vm7, %v453_v19, %v457_v29  ;;  %s762_s30 = sshll.u32 %s883_s2, 4  ;;  %s763_s30 = int_to_ptr.vmem [resolvable:$true] %s762_s30 }
 0x103   :  { %v501_v32 = vmul.f32 %v483_v24, %v468_v30  ;;  %v497_v33 = vmul.f32 %v483_v24, %v467_v31  ;;  %s842_s5 = scalar_lea.vmem %s763_s30, 1024  ;;  %p847_p3 = scmp.lt.s32.totalorder %s763_s30, %s763_s30 }
 0x104   :  { %p843_p2 = scmp.ne.s32.totalorder %s763_s30, %s842_s5  ;;  %p848_p4 = scmp.lt.s32.totalorder %s842_s5, %s842_s5 }
 0x105   :  { %v463_v36 = vpop.permute.xlu1 %462  ;;  %v461_v37 = vpop.permute.xlu0 %460  ;;  %v505_v38 = vpack.c.bf16 %v501_v32, %v497_v33  ;;  %v733_v33 = vmul.f32 2.0, %v941_v1 }
 0x106   :  { %v466_v40 = vsel %vm464_vm7, %v459_v28, %v463_v36  ;;  %v472_v41 = vsel %vm464_vm7, %v463_v36, %v451_v12  ;;  %v465_v42 = vsel %vm464_vm7, %v457_v29, %v461_v37  ;;  %v471_v43 = vsel %vm464_vm7, %v461_v37, %v449_v13  ;;  %p849_p5 = por %p848_p4, %p847_p3 }
 0x107   :  { %v502_v44 = vmul.f32 %v487_v34, %v466_v40  ;;  %v503_v45 = vmul.f32 %v491_v35, %v472_v41  ;;  %v498_v46 = vmul.f32 %v487_v34, %v465_v42  ;;  %v499_v47 = vmul.f32 %v491_v35, %v471_v43  ;;  %653 = vmatprep.subr.bf16.mxu0 %v505_v38 }
 0x108   :  { %654 = vmatpush1.bf16.msra.mxu0 %v504_v39  ;;  %v551_v12 = vrot.slane %v538_v52, %v1030_v20  ;;  %v555_v13 = vrot.slane %v538_v52, %v1040_v25  ;;  %v734_v35 = vmul.f32 2.0, %v939_v0  ;;  %v737_v37 = vmul.f32 2.0, %v947_v3  ;;  %p850_p6 = pnand %p849_p5, %p843_p2 }
 0x109   :  { %v515_v48 = vpop.permute.xlu1 %514  ;;  %v513_v49 = vpop.permute.xlu0 %512  ;;  %v507_v50 = vpack.c.bf16 %v503_v45, %v499_v47  ;;  %v506_v51 = vpack.c.bf16 %v502_v44, %v498_v46  ;;  %v738_v44 = vmul.f32 2.0, %v945_v2  ;;  %v735_v46 = vmul.f32 2.0, %v953_v5 }
 0x10b   :  { %696 = vmatprep.subr.bf16.mxu1 %v507_v50 }
 0x10c   :  { %697 = vmatpush1.bf16.msra.mxu1 %v506_v51  ;;  %v736_v51 = vmul.f32 2.0, %v959_v7 }
 0x10d   :  { %v519_v54 = vpop.permute.xlu1 %518  ;;  %v517_v55 = vpop.permute.xlu0 %516 }
 0x10e   :  { %v534_v56 = vsel %vm528_vm8, %v515_v48, %v519_v54  ;;  %v533_v57 = vsel %vm528_vm8, %v513_v49, %v517_v55 }
 0x10f   :  { %v564_v59 = vmul.f32 %v543_v53, %v534_v56  ;;  %v560_v60 = vmul.f32 %v543_v53, %v533_v57 }
 0x111   :  { %v523_v61 = vpop.permute.xlu1 %522  ;;  %v521_v62 = vpop.permute.xlu0 %520  ;;  %v568_v11 = vpack.c.bf16 %v564_v59, %v560_v60 }
 0x112   :  { %v532_v63 = vsel %vm528_vm8, %v519_v54, %v523_v61  ;;  %v531_v22 = vsel %vm528_vm8, %v517_v55, %v521_v62  ;;  %v739_v55 = vmul.f32 2.0, %v951_v4 }
 0x113   :  { %v565_v8 = vmul.f32 %v547_v58, %v532_v63  ;;  %v561_v9 = vmul.f32 %v547_v58, %v531_v22  ;;  %v740_v58 = vmul.f32 2.0, %v957_v6 }
 0x115   :  { %v527_v14 = vpop.permute.xlu1 %526  ;;  %v525_v15 = vpop.permute.xlu0 %524  ;;  %v569_v16 = vpack.c.bf16 %v565_v8, %v561_v9 }
 0x116   :  { %v530_v17 = vsel %vm528_vm8, %v523_v61, %v527_v14  ;;  %v536_v18 = vsel %vm528_vm8, %v527_v14, %v515_v48  ;;  %v529_v19 = vsel %vm528_vm8, %v521_v62, %v525_v15  ;;  %v535_v21 = vsel %vm528_vm8, %v525_v15, %v513_v49 }
 0x117   :  { %v566_v23 = vmul.f32 %v551_v12, %v530_v17  ;;  %v567_v20 = vmul.f32 %v555_v13, %v536_v18  ;;  %v562_v24 = vmul.f32 %v551_v12, %v529_v19  ;;  %v563_v25 = vmul.f32 %v555_v13, %v535_v21  ;;  %655 = vmatprep.subr.bf16.mxu0 %v569_v16 }
 0x118   :  { %656 = vmatpush1.bf16.msra.mxu0 %v568_v11 }
 0x119   :  { %v571_v27 = vpack.c.bf16 %v567_v20, %v563_v25  ;;  %v570_v28 = vpack.c.bf16 %v566_v23, %v562_v24 }
 0x11b   :  { %698 = vmatprep.subr.bf16.mxu1 %v571_v27  ;;  %672 = vmatmul.mubr.bf16.vlgmr.msra.gmra.mrb[0].mxu0 %v795_v26 }
 0x11c   :  { %699 = vmatpush1.bf16.msra.mxu1 %v570_v28 }
 0x11f   :  { %715 = vmatmul.mubr.bf16.vlgmr.msra.gmra.mrb[0].mxu1 %v795_v26 }
 0x126   :  { %v624_v10 = vpop.permute.xlu1 %623 }
 0x127   :  { %v619_v29 = vpop.permute.xlu0 %618 }
 0x1ee   :  { %v673_v30 = vpop.f32.mrb[0].mxu0 }
 0x1ef   :  { %v675_v31 = vpop.f32.mrb[1].mxu0  ;;  %v674_v32 = vadd.f32 %v673_v30, %v619_v29 }
 0x1f0   :  { %v677_v34 = vpop.f32.mrb[2].mxu0  ;;  %v676_v36 = vadd.f32 %v675_v31, %v619_v29 }
 0x1f1   :  { %v678_v38 = vadd.f32 %v677_v34, %v624_v10  ;;  %v725_v39 = vmax.f32 %v674_v32, 0.0  ;;  %v679_v40 = vpop.f32.mrb[3].mxu0 }
 0x1f2   :  { %v716_v41 = vpop.f32.mrb[0].mxu1  ;;  %v726_v42 = vmax.f32 %v676_v36, 0.0  ;;  %v680_v43 = vadd.f32 %v679_v40, %v624_v10 }
 0x1f3   :  { %v729_v45 = vmax.f32 %v678_v38, 0.0  ;;  %v717_v47 = vadd.f32 %v716_v41, %v619_v29  ;;  %v741_v48 = vadd.f32 %v733_v33, %v725_v39  ;;  %v718_v1 = vpop.f32.mrb[1].mxu1 }
 0x1f4   :  { %v742_v49 = vadd.f32 %v734_v35, %v726_v42  ;;  %v730_v50 = vmax.f32 %v680_v43, 0.0  ;;  %v719_v0 = vadd.f32 %v718_v1, %v619_v29  ;;  %v720_v3 = vpop.f32.mrb[2].mxu1 }
 0x1f5   :  { %v745_v52 = vadd.f32 %v737_v37, %v729_v45  ;;  %v727_v53 = vmax.f32 %v717_v47, 0.0  ;;  %749 = vst [vmem:[#allocation8] sm:$0xff] %v741_v48  ;;  %v721_v54 = vadd.f32 %v720_v3, %v624_v10  ;;  %v722_v56 = vpop.f32.mrb[3].mxu1 }
 0x1f6   :  { %750 = vst [vmem:[#allocation8 + $0x8] sm:$0xff] %v742_v49  ;;  %v746_v2 = vadd.f32 %v738_v44, %v730_v50  ;;  %v728_v57 = vmax.f32 %v719_v0, 0.0  ;;  %v723_v5 = vadd.f32 %v722_v56, %v624_v10 }
 0x1f7   :  { %753 = vst [vmem:[#allocation8 + $0x20] sm:$0xff] %v745_v52  ;;  %v743_v59 = vadd.f32 %v735_v46, %v727_v53  ;;  %v731_v60 = vmax.f32 %v721_v54, 0.0 }
 0x1f8   :  { %754 = vst [vmem:[#allocation8 + $0x28] sm:$0xff] %v746_v2  ;;  %v744_v7 = vadd.f32 %v736_v51, %v728_v57  ;;  %v732_v61 = vmax.f32 %v723_v5, 0.0 }
 0x1f9   :  { %751 = vst [vmem:[#allocation8 + $0x10] sm:$0xff] %v743_v59  ;;  %v747_v62 = vadd.f32 %v739_v55, %v731_v60 }
 0x1fa   :  { %752 = vst [vmem:[#allocation8 + $0x18] sm:$0xff] %v744_v7  ;;  %v748_v63 = vadd.f32 %v740_v58, %v732_v61 }
 0x1fb   :  { %755 = vst [vmem:[#allocation8 + $0x30] sm:$0xff] %v747_v62 }
 0x1fc   :  { %756 = vst [vmem:[#allocation8 + $0x38] sm:$0xff] %v748_v63 }
 0x1fd   :  { %853 = shalt.err (!%p850_p6)
}
 0x1fe   :  { %s854_s8 = scalar_lea.hbm %s1252_s4, 1024 }
 0x1ff   :  { %p855_p7 = scmp.ne.s32.totalorder %s1252_s4, %s854_s8  ;;  %p858_p8 = scmp.lt.u32.totalorder %s854_s8, %s1252_s4 }
 0x201   :  { %p860_p9 = pnand %p858_p8, %p855_p7 }
 0x203   :  { %863 = shalt.err (!%p860_p9)
}
 0x204   :  { %768 = dma.vmem_to_hbm [thread:$0]  %s763_s30, 1024, %s1252_s4, [#allocation5], %s871_s25, %s871_s25, %s872_s26  }
 0x205   :  { %868 = dma.done.wait [#allocation5], 1024  }
 0x206   :  { %869 = vsyncadd [#allocation5], 4294966272 }
 0x207   :  { %772 = vsyncpa [#allocation4], 1 }
 0x208   :  { %773 = vsyncpa [#allocation7], 1 }
 0x209   :  { %774 = vsyncpa [#allocation5], 1 }

</bundles_post_ra>
